<compile_context>
chip_gen: v7x
topology: tpu7x:2x2x1
jax: 0.10.0
libtpu: 0.0.40
codegen_flags: <defaults>
</compile_context>

<pallas_src>
import functools

import jax
import jax.numpy as jnp
from jax import lax
from jax.experimental import pallas as pl
from jax.experimental.pallas import tpu as pltpu

TAB_DIM = 3       # age (1) + anatom_site (1) + sex (1)
HIDDEN = 256      # fc1 output width (fixed by the module)


def _round_up(x, m):
    return (x + m - 1) // m * m


def _vmem_capacity_bytes():
    try:
        return int(pltpu.get_tpu_info().vmem_capacity_bytes)
    except Exception:
        return 64 * 1024 * 1024            # conservative fallback: v7x per-TC VMEM


def _pick_batch_block(B):
    """Batch block rows.

    Must be a multiple of 8 or equal to B (full-extent exemption on the second-to-last
    dim of the 2-D operand blocks).  For B >= 16 force at least two batch blocks so the
    "parallel" grid axis can span both TensorCores on v7x; a partial trailing block is
    fine because batch rows are independent and out-of-bounds rows never reach HBM.
    """
    if B < 16:
        return B
    return max(8, min(128, (B // 2) // 8 * 8))


def _pick_c_tile(bt, C, S, itemsize, budget_bytes):
    """Largest channel tile whose (bt, c_tile, S) img block fits the per-buffer budget.

    The pipeline double-buffers the block, so peak img VMEM ~= 2 * budget_bytes.
    Prefers a multiple-of-8 divisor of C (no remainder); otherwise the remainder is
    masked in-kernel.
    """
    s_lanes = _round_up(S, 128)                       # VMEM lane padding of the S axis
    per_c = max(1, bt * s_lanes * itemsize)
    cap = max(8, (budget_bytes // per_c) // 8 * 8)
    if cap >= C:
        return C                                      # whole channel axis in one block
    for t in range(cap, 7, -8):                       # prefer an exact divisor
        if C % t == 0:
            return t
    return cap                                        # remainder handled by masking


def _mbc_head_kernel(img_ref, tabb_ref, w1x_ref, w2_ref, b2_ref, out_ref, acc_ref,
                     *, c_total, c_tile, mask_tail):
    c = pl.program_id(1)

    @pl.when(c == 0)
    def _zero():
        acc_ref[...] = jnp.zeros_like(acc_ref)

    # Spatial SUM over the lane axis (S); avg_pool2d's 1/(H*W) is folded into w1x.
    # The upcast is a no-op for f32 inputs and gives f32 accumulation for bf16 inputs.
    pooled = jnp.sum(img_ref[...].astype(jnp.float32), axis=-1)       # (bt, c_tile)
    w1 = w1x_ref[...].astype(jnp.float32)                             # (c_tile, 256)

    if mask_tail:
        # Last channel block overruns C: zero the stale channels on both operands
        # (guards against NaN/Inf garbage in the out-of-bounds region).
        valid = c_total - c * c_tile
        pooled = jnp.where(
            lax.broadcasted_iota(jnp.int32, pooled.shape, 1) < valid, pooled, 0.0)
        w1 = jnp.where(
            lax.broadcasted_iota(jnp.int32, w1.shape, 0) < valid, w1, 0.0)

    # Fused avg-pool + fc1 (image half), accumulated over channel tiles.
    acc_ref[...] += jnp.dot(pooled, w1, preferred_element_type=jnp.float32)

    @pl.when(c == pl.num_programs(1) - 1)
    def _epilogue():
        # tab_bias = cat(age, anatom_site, sex) @ W1[C:] + b1  (precomputed host-side).
        h = jnp.maximum(acc_ref[...] + tabb_ref[...], 0.0)            # ReLU(fc1)
        # Dropout(p=0.5): identity in eval mode.
        out_ref[...] = (jnp.dot(h, w2_ref[...].astype(jnp.float32),
                                preferred_element_type=jnp.float32)
                        + b2_ref[...])                                # (bt, num_classes)


def mbc_forward(feature_map, age, anatom_site, sex, params, *,
                param_dtype=jnp.bfloat16, batch_block=None, c_tile=None):
    """Head of MultiModalbileductClassifier_2d (eval mode).

    feature_map: (B, C, H, W) backbone output (NCHW, f32 or bf16 — streamed as-is).
    age / anatom_site / sex: (B,) or (B, 1) tabular scalars.
    params: 'w1' (C+3, 256), 'b1' (1, 256), 'w2' (256, num_classes), 'b2' (1, num_classes)
            stored (in_dim, out_dim) so the math is x @ W + b.
    """
    B, C, H, W = feature_map.shape
    S = H * W
    num_classes = params["w2"].shape[1]

    # Free reshape (contiguous collapse): no cast / transpose / pad pass over HBM.
    img = feature_map.reshape(B, C, S)
    itemsize = jnp.dtype(img.dtype).itemsize
    # TODO(synk): if the backbone can emit channels-last bf16 (B,H,W,C), stream that
    # layout instead (C on lanes) to halve feature-map traffic again.

    # torch.cat((age, anatom_site, sex), dim=1) and its fc1 contribution + bias,
    # computed host-side (trivial (B,3)@(3,256) — removes lane-sparse operands).
    tab = jnp.concatenate([age.reshape(B, 1), anatom_site.reshape(B, 1),
                           sex.reshape(B, 1)], axis=1).astype(jnp.float32)
    w1 = params["w1"].astype(jnp.float32)
    b1 = params["b1"].reshape(1, HIDDEN).astype(jnp.float32)
    w1x = (w1[:C] * (1.0 / S)).astype(param_dtype)          # fc1 image weights, 1/S folded
    tab_bias = (tab @ w1[C:] + b1).astype(jnp.float32)      # (B, 256)
    w2 = params["w2"].astype(param_dtype)                   # (256, num_classes)
    b2 = params["b2"].reshape(1, num_classes).astype(jnp.float32)

    # Generation-aware sizing: per-buffer budget ~= VMEM/8, scoped limit ~= 0.75*VMEM.
    cap = _vmem_capacity_bytes()
    bt = batch_block if batch_block is not None else _pick_batch_block(B)
    if c_tile is None:
        c_tile = _pick_c_tile(bt, C, S, itemsize, budget_bytes=cap // 8)
    nb = pl.cdiv(B, bt)
    nc = pl.cdiv(C, c_tile)
    mask_tail = (C % c_tile) != 0
    vmem_limit = int(cap * 0.75)

    flops = (B * C * S                                      # pooling adds
             + 2 * B * (C + TAB_DIM) * HIDDEN               # fc1
             + 2 * B * HIDDEN * num_classes)                # fc2
    bytes_accessed = (img.size * itemsize
                      + nb * w1x.size * jnp.dtype(param_dtype).itemsize
                      + tab_bias.size * 4
                      + w2.size * jnp.dtype(param_dtype).itemsize + b2.size * 4
                      + B * num_classes * 4)

    kernel = functools.partial(_mbc_head_kernel, c_total=C, c_tile=c_tile,
                               mask_tail=mask_tail)

    out = pl.pallas_call(
        kernel,
        out_shape=jax.ShapeDtypeStruct((B, num_classes), jnp.float32),
        grid=(nb, nc),
        in_specs=[
            pl.BlockSpec((bt, c_tile, S), lambda b, c: (b, c, 0)),     # streamed NCHW map
            pl.BlockSpec((bt, HIDDEN), lambda b, c: (b, 0)),           # tab@W1[C:] + b1
            pl.BlockSpec((c_tile, HIDDEN), lambda b, c: (c, 0)),       # fc1 image weights
            pl.BlockSpec((HIDDEN, num_classes), lambda b, c: (0, 0)),  # fc2 weight (resident)
            pl.BlockSpec((1, num_classes), lambda b, c: (0, 0)),       # fc2 bias (resident)
        ],
        out_specs=pl.BlockSpec((bt, num_classes), lambda b, c: (b, 0)),
        scratch_shapes=[pltpu.VMEM((bt, HIDDEN), jnp.float32)],        # fc1 accumulator
        compiler_params=pltpu.CompilerParams(
            dimension_semantics=("parallel", "arbitrary"),
            vmem_limit_bytes=vmem_limit),
        cost_estimate=pl.CostEstimate(flops=flops, transcendentals=0,
                                      bytes_accessed=bytes_accessed),
    )(img, tab_bias, w1x, w2, b2)
    return out


def make_params(key, num_features, num_classes):
    """Deterministic parameter init (shapes follow the module's __init__)."""
    k1, k2, k3, k4 = jax.random.split(key, 4)
    in_dim = num_features + TAB_DIM
    return {
        "w1": jax.random.normal(k1, (in_dim, HIDDEN), jnp.float32) * 0.05,
        "b1": jax.random.normal(k2, (1, HIDDEN), jnp.float32) * 0.05,
        "w2": jax.random.normal(k3, (HIDDEN, num_classes), jnp.float32) * 0.05,
        "b2": jax.random.normal(k4, (1, num_classes), jnp.float32) * 0.05,
    }


def mbc_forward_ref(feature_map, age, anatom_site, sex, params):
    """Plain-JAX f32 reference mirroring the PyTorch forward (eval mode)."""
    B, C = feature_map.shape[:2]
    x = jnp.mean(feature_map.astype(jnp.float32).reshape(B, C, -1), axis=-1)
    tab = jnp.concatenate([age.reshape(B, 1), anatom_site.reshape(B, 1),
                           sex.reshape(B, 1)], axis=1).astype(jnp.float32)
    combined = jnp.concatenate([x, tab], axis=1)
    h = jnp.maximum(combined @ params["w1"] + params["b1"].reshape(1, -1), 0.0)
    return h @ params["w2"] + params["b2"].reshape(1, -1)


def mbc_forward_ref_quant(feature_map, age, anatom_site, sex, params, param_dtype):
    """Reference mirroring the kernel's parameter rounding (bf16 weights, f32 math)."""
    B, C = feature_map.shape[:2]
    S = feature_map.shape[2] * feature_map.shape[3]
    pooled_sum = jnp.sum(feature_map.astype(jnp.float32).reshape(B, C, -1), axis=-1)
    w1 = params["w1"].astype(jnp.float32)
    w1x = (w1[:C] * (1.0 / S)).astype(param_dtype).astype(jnp.float32)
    tab = jnp.concatenate([age.reshape(B, 1), anatom_site.reshape(B, 1),
                           sex.reshape(B, 1)], axis=1).astype(jnp.float32)
    h = jnp.maximum(pooled_sum @ w1x + tab @ w1[C:] + params["b1"].reshape(1, -1), 0.0)
    w2 = params["w2"].astype(param_dtype).astype(jnp.float32)
    return h @ w2 + params["b2"].reshape(1, -1)


if __name__ == "__main__":
    key = jax.random.PRNGKey(0)

    def run_case(case_id, B, C, H, W, num_classes, c_tile):
        k = jax.random.fold_in(key, case_id)
        k_img, k_age, k_site, k_sex, k_param = jax.random.split(k, 5)
        feature_map = jax.random.normal(k_img, (B, C, H, W), jnp.float32)
        age = jax.random.normal(k_age, (B,), jnp.float32)
        anatom_site = jax.random.normal(k_site, (B,), jnp.float32)
        sex = jax.random.normal(k_sex, (B,), jnp.float32)
        params = make_params(k_param, C, num_classes)

        out = mbc_forward(feature_map, age, anatom_site, sex, params, c_tile=c_tile)
        out = jax.block_until_ready(out)
        assert out.shape == (B, num_classes)

        # Tight check vs. a reference replicating the kernel's bf16 weight rounding,
        # loose check vs. the pure-f32 PyTorch-module semantics.
        ref_q = mbc_forward_ref_quant(feature_map, age, anatom_site, sex, params,
                                      jnp.bfloat16)
        ref_f = mbc_forward_ref(feature_map, age, anatom_site, sex, params)
        assert jnp.allclose(out, ref_q, atol=5e-4, rtol=5e-4), f"case {case_id}: quant ref mismatch"
        assert jnp.allclose(out, ref_f, atol=3e-2, rtol=3e-2), f"case {case_id}: f32 ref mismatch"

    # Case 0: clean channel tiling (C=32, c_tile=8 -> 4 reduction steps):
    # exercises the zero / accumulate / epilogue path.
    run_case(0, B=2, C=32, H=16, W=16, num_classes=4, c_tile=8)
    # Case 1: ResNet-like 7x7 map (S=49, full-extent lane dim, not a multiple of 128)
    # with a channel remainder (C=40, c_tile=16): exercises the in-kernel tail masking.
    run_case(1, B=2, C=40, H=7, W=7, num_classes=4, c_tile=16)

    print("KERNEL_OK")
</pallas_src>

<mosaic_0001>
module attributes {stable_mosaic.version = 11 : i64} {
  func.func @_mbc_head_kernel(%arg0: i32, %arg1: i32, %arg2: memref<2x8x256xf32, #tpu.memory_space<vmem>>, %arg3: memref<2x256xf32, #tpu.memory_space<vmem>>, %arg4: memref<8x256xbf16, #tpu.memory_space<vmem>>, %arg5: memref<256x4xbf16, #tpu.memory_space<vmem>>, %arg6: memref<1x4xf32, #tpu.memory_space<vmem>>, %arg7: memref<2x4xf32, #tpu.memory_space<vmem>>, %arg8: memref<2x256xf32, #tpu.memory_space<vmem>>) attributes {dimension_semantics = [#tpu.dimension_semantics<parallel>, #tpu.dimension_semantics<arbitrary>], iteration_bounds = array<i64: 1, 4>, scalar_prefetch = 0 : i64, scratch_operands = 1 : i64, tpu.core_type = #tpu.core_type<tc>, window_params = [{transform_indices = @transform_0, window_bounds = array<i64: 2, 8, 256>}, {transform_indices = @transform_1, window_bounds = array<i64: 2, 256>}, {transform_indices = @transform_2, window_bounds = array<i64: 8, 256>}, {pipeline_mode = #tpu.pipeline_mode<synchronous>, transform_indices = @transform_3, window_bounds = array<i64: 256, 4>}, {pipeline_mode = #tpu.pipeline_mode<synchronous>, transform_indices = @transform_4, window_bounds = array<i64: 1, 4>}, {transform_indices = @transform_5, window_bounds = array<i64: 2, 4>}]} {
    %c0_i32 = arith.constant 0 : i32
    %0 = arith.cmpi eq, %arg1, %c0_i32 : i32
    %1 = arith.extui %0 : i1 to i32
    %c0_i32_0 = arith.constant 0 : i32
    %2 = arith.cmpi ne, %1, %c0_i32_0 : i32
    scf.if %2 {
      %cst_11 = arith.constant 0.000000e+00 : f32
      %14 = vector.broadcast %cst_11 : f32 to vector<2x256xf32>
      %c0_12 = arith.constant 0 : index
      %c0_13 = arith.constant 0 : index
      %15 = vector.load %arg8[%c0_12, %c0_13] : memref<2x256xf32, #tpu.memory_space<vmem>>, vector<2x256xf32>
      tpu.vector_store %arg8[%c0_12, %c0_13], %14 {strides = array<i32>} : memref<2x256xf32, #tpu.memory_space<vmem>>, vector<2x256xf32>,
    } else {
    }
    %c0 = arith.constant 0 : index
    %c0_1 = arith.constant 0 : index
    %c0_2 = arith.constant 0 : index
    %3 = vector.load %arg2[%c0, %c0_1, %c0_2] : memref<2x8x256xf32, #tpu.memory_space<vmem>>, vector<2x8x256xf32>
    %cst = arith.constant dense<0.000000e+00> : vector<2x8xf32>
    %4 = vector.multi_reduction <add>, %3, %cst [2] : vector<2x8x256xf32> to vector<2x8xf32>
    %c0_3 = arith.constant 0 : index
    %c0_4 = arith.constant 0 : index
    %5 = vector.load %arg4[%c0_3, %c0_4] : memref<8x256xbf16, #tpu.memory_space<vmem>>, vector<8x256xbf16>
    %6 = arith.extf %5 : vector<8x256xbf16> to vector<8x256xf32>
    %c0_5 = arith.constant 0 : index
    %c0_6 = arith.constant 0 : index
    %7 = vector.load %arg8[%c0_5, %c0_6] : memref<2x256xf32, #tpu.memory_space<vmem>>, vector<2x256xf32>
    %cst_7 = arith.constant dense<0.000000e+00> : vector<2x256xf32>
    %8 = tpu.matmul %4, %6, %cst_7 {dimension_numbers = #tpu.dot_dimension_numbers<[1], [0], [0], [1], [0, 0, 1, 1], [], []>} : vector<2x8xf32>, vector<8x256xf32>, vector<2x256xf32> -> vector<2x256xf32>
    %9 = arith.addf %7, %8 : vector<2x256xf32>
    %c0_8 = arith.constant 0 : index
    %c0_9 = arith.constant 0 : index
    %10 = vector.load %arg8[%c0_8, %c0_9] : memref<2x256xf32, #tpu.memory_space<vmem>>, vector<2x256xf32>
    tpu.vector_store %arg8[%c0_8, %c0_9], %9 {strides = array<i32>} : memref<2x256xf32, #tpu.memory_space<vmem>>, vector<2x256xf32>,
    %c3_i32 = arith.constant 3 : i32
    %11 = arith.cmpi eq, %arg1, %c3_i32 : i32
    %12 = arith.extui %11 : i1 to i32
    %c0_i32_10 = arith.constant 0 : i32
    %13 = arith.cmpi ne, %12, %c0_i32_10 : i32
    scf.if %13 {
      %c0_11 = arith.constant 0 : index
      %c0_12 = arith.constant 0 : index
      %14 = vector.load %arg8[%c0_11, %c0_12] : memref<2x256xf32, #tpu.memory_space<vmem>>, vector<2x256xf32>
      %c0_13 = arith.constant 0 : index
      %c0_14 = arith.constant 0 : index
      %15 = vector.load %arg3[%c0_13, %c0_14] : memref<2x256xf32, #tpu.memory_space<vmem>>, vector<2x256xf32>
      %16 = arith.addf %14, %15 : vector<2x256xf32>
      %cst_15 = arith.constant 0.000000e+00 : f32
      %17 = vector.broadcast %cst_15 : f32 to vector<2x256xf32>
      %18 = arith.maximumf %16, %17 : vector<2x256xf32>
      %c0_16 = arith.constant 0 : index
      %c0_17 = arith.constant 0 : index
      %19 = vector.load %arg5[%c0_16, %c0_17] : memref<256x4xbf16, #tpu.memory_space<vmem>>, vector<256x4xbf16>
      %20 = arith.extf %19 : vector<256x4xbf16> to vector<256x4xf32>
      %cst_18 = arith.constant dense<0.000000e+00> : vector<2x4xf32>
      %21 = tpu.matmul %18, %20, %cst_18 {dimension_numbers = #tpu.dot_dimension_numbers<[1], [0], [0], [1], [0, 0, 1, 1], [], []>} : vector<2x256xf32>, vector<256x4xf32>, vector<2x4xf32> -> vector<2x4xf32>
      %c0_19 = arith.constant 0 : index
      %c0_20 = arith.constant 0 : index
      %22 = vector.load %arg6[%c0_19, %c0_20] : memref<1x4xf32, #tpu.memory_space<vmem>>, vector<1x4xf32>
      %23 = vector.broadcast %22 : vector<1x4xf32> to vector<2x4xf32>
      %24 = arith.addf %21, %23 : vector<2x4xf32>
      %c0_21 = arith.constant 0 : index
      %c0_22 = arith.constant 0 : index
      %25 = vector.load %arg7[%c0_21, %c0_22] : memref<2x4xf32, #tpu.memory_space<vmem>>, vector<2x4xf32>
      tpu.vector_store %arg7[%c0_21, %c0_22], %24 {strides = array<i32>} : memref<2x4xf32, #tpu.memory_space<vmem>>, vector<2x4xf32>,
    } else {
    }
    return
  }
  func.func @transform_0(%arg0: i32, %arg1: i32) -> (i32, i32, i32) {
    %c0_i32 = arith.constant 0 : i32
    %c0_i32_0 = arith.constant 0 : i32
    return %arg0, %arg1, %c0_i32 : i32, i32, i32
  }
  func.func @transform_1(%arg0: i32, %arg1: i32) -> (i32, i32) {
    %c0_i32 = arith.constant 0 : i32
    %c0_i32_0 = arith.constant 0 : i32
    return %arg0, %c0_i32 : i32, i32
  }
  func.func @transform_2(%arg0: i32, %arg1: i32) -> (i32, i32) {
    %c0_i32 = arith.constant 0 : i32
    %c0_i32_0 = arith.constant 0 : i32
    return %arg1, %c0_i32 : i32, i32
  }
  func.func @transform_3(%arg0: i32, %arg1: i32) -> (i32, i32) {
    %c0_i32 = arith.constant 0 : i32
    %c0_i32_0 = arith.constant 0 : i32
    %c0_i32_1 = arith.constant 0 : i32
    return %c0_i32, %c0_i32_0 : i32, i32
  }
  func.func @transform_4(%arg0: i32, %arg1: i32) -> (i32, i32) {
    %c0_i32 = arith.constant 0 : i32
    %c0_i32_0 = arith.constant 0 : i32
    %c0_i32_1 = arith.constant 0 : i32
    return %c0_i32, %c0_i32_0 : i32, i32
  }
  func.func @transform_5(%arg0: i32, %arg1: i32) -> (i32, i32) {
    %c0_i32 = arith.constant 0 : i32
    %c0_i32_0 = arith.constant 0 : i32
    return %arg0, %c0_i32 : i32, i32
  }
}

</mosaic_0001>

<bundles_post_ra>
// kernel: tpu_custom_call.1
= control target key start
LH: loop header
LB: loop body
LE: loop exit
PB: predicated region body
PF: predicated region fallthrough
CT: control target
= control target key end

     0   :  { %10 = vsyncpa [#allocation5], 0  ;;  %s1273_s0 = inlined_call_operand.vmem [shape: f32[2,32,256], index: 0, kind: input, shape index: {}]   ;;  %s1274_s1 = inlined_call_operand.vmem [shape: f32[2,256], index: 1, kind: input, shape index: {}]   ;;  %s1275_s2 = inlined_call_operand.hbm [shape: bf16[32,256], index: 2, kind: input, shape index: {}]   ;;  %s1276_s3 = inlined_call_operand.vmem [shape: bf16[256,4], index: 3, kind: input, shape index: {}]   ;;  %s1277_s4 = inlined_call_operand.vmem [shape: f32[1,4], index: 4, kind: input, shape index: {}]   ;;  %s1278_s5 = inlined_call_operand.hbm [shape: f32[2,4], index: 5, kind: output, shape index: {}]  }
   0x1   :  { %12 = vsyncpa [#allocation5 + $0x1], 0 }
   0x2   :  { %13 = vsyncpa [#allocation6], 0  ;;  %s1080_s18 = smov 0   ;;  %s1082_s19 = smov 0  }
   0x3   :  { %s1084_s20 = smov 0   ;;  %s1086_s21 = smov 0  }
   0x4   :  { %s1088_s22 = smov 0   ;;  %s1090_s23 = smov 0  }
   0x5 LB: > { %s706_s24 = sadd.s32 4294967295, %s1043_s23   ;;  %s28_s25 = sadd.s32 1, %s1039_s22  ;;  %s1043_s23 = sphi %s1090_s23, %s19_s23   ;;  %s1039_s22 = sphi %s1088_s22, %s1288_s22   ;;  %s1035_s21 = sphi %s1086_s21, %s1287_s21   ;;  %s1031_s20 = sphi %s1084_s20, %s1286_s20   ;;  %s1027_s19 = sphi %s1082_s19, %s1285_s19   ;;  %s1023_s18 = sphi %s1080_s18, %s1284_s18  }
   0x6   : > { %p29_p0 = scmp.ge.s32.totalorder %s28_s25, 4  ;;  %s40_s26 = sadd.s32 1, %s1031_s20 }
   0x7   : > { %p47_p1 = scmp.ne.s32.totalorder %s1031_s20, %s1027_s19  ;;  %p48_p2 = scmp.eq.s32.totalorder %s1043_s23, 0 }
   0x8   : > { %s1290_s25 = smov (%p29_p0, %s28_s25), 0  ;;  %p105_p4 = scmp.ne.s32.totalorder %s1027_s19, %s1023_s18 }
   0x9   : > { %p1116_p3 = por %p48_p2, %p47_p1  ;;  %s36_s28 = ssub.s32 %s1039_s22, %s1290_s25 }
   0xa   : > { %p106_p5 = scmp.eq.s32.totalorder %s706_s24, 0  ;;  %p38_p6 = scmp.eq.s32.totalorder %s36_s28, 0 }
   0xb   : > { %p709_p8 = scmp.ge.s32.totalorder %s1043_s23, 4 }
   0xc   : > { %p1125_p7 = por %p106_p5, %p105_p4 }
   0xd   : > { %s1130_s30 = scalar_select %p38_p6, %s1031_s20, %s40_s26  }
   0xe   : > { %s1281_s29 = scalar_select %p1125_p7, 1, 0 }
   0xf   : > { %207 = sbr.rel (%p709_p8) target bundleno = 54 (0x36), region = 28 }
  0x16   : > { %210 = sbr.rel (!%p1116_p3) target bundleno = 29 (0x1d), region = 32  ;;  %s212_s6 = sand.u32 (%p1116_p3), 1, %s1031_s20  }
  0x17   : > { %s727_s7 = sshll.u32 (%p1116_p3), %s1039_s22, 4  ;;  %s710_s8 = sshll.u32 (%p1116_p3), %s212_s6, 5 }
  0x18   : > { %s220_s11 = scalar_lea.vmem (%p1116_p3), %s1273_s0, %s727_s7  ;;  %s214_s12 = scalar_lea.vmem (%p1116_p3), [#allocation3], %s710_s8 }
  0x19   : > { %v233_v0 = vld [vmem:[%s220_s11] sm:$0xff] (%p1116_p3)  ;;  %v235_v1 = vld [vmem:[%s220_s11 + $0x8] sm:$0xff] (%p1116_p3) }
  0x1a   : > { %v237_v2 = vld [vmem:[%s220_s11 + $0x40] sm:$0xff] (%p1116_p3)  ;;  %234 = vst [vmem:[%s214_s12] sm:$0xff] (%p1116_p3), %v233_v0  ;;  %236 = vst [vmem:[%s214_s12 + $0x8] sm:$0xff] (%p1116_p3), %v235_v1  ;;  %v239_v3 = vld [vmem:[%s220_s11 + $0x48] sm:$0xff] (%p1116_p3) }
  0x1b   : > { %238 = vst [vmem:[%s214_s12 + $0x10] sm:$0xff] (%p1116_p3), %v237_v2  ;;  %240 = vst [vmem:[%s214_s12 + $0x18] sm:$0xff] (%p1116_p3), %v239_v3 }
  0x1d PF: > { %s247_s13 = sand.u32 1, %s1031_s20   ;;  %s728_s14 = sshll.u32 %s1039_s22, 7 }
  0x1e   : > { %s713_s15 = sshll.u32 %s247_s13, 3  ;;  %s1145_s18 = scalar_lea.hbm %s1275_s2, %s728_s14 }
  0x1f   : > { %s251_s26 = scalar_lea.vmem [#allocation4], %s713_s15  ;;  %s248_s6 = scalar_lea.sflag [#allocation5], %s247_s13 }
  0x20   : > { %s259_s28 = sshll.u32 %s251_s26, 4  ;;  %s935_s7 = scalar_lea.hbm %s1145_s18, 128  ;;  %s260_s28 = int_to_ptr.vmem [resolvable:$true] %s259_s28 }
  0x21   : > { %p936_p9 = scmp.ne.s32.totalorder %s1145_s18, %s935_s7  ;;  %s939_s10 = scalar_lea.hbm %s1275_s2, 512 }
  0x22   : > { %p940_p12 = scmp.lt.u32.totalorder %s1145_s18, %s1275_s2  ;;  %p941_p13 = scmp.lt.u32.totalorder %s939_s10, %s935_s7 }
  0x23   : > { %p937_p10 = pnand %p936_p9, %p1116_p3  ;;  %p943_p1 = scmp.lt.u32.totalorder %s935_s7, %s1145_s18 }
  0x24   : > { %p942_p0 = por %p941_p13, %p940_p12 }
  0x25   : > { %p938_p11 = pneg %p937_p10 }
  0x26   : > { %p944_p2 = por %p943_p1, %p942_p0 }
  0x28   : > { %p945_p4 = pnand %p944_p2, %p938_p11 }
  0x2a   : > { %948 = shalt.err (!%p945_p4)
}
  0x2b   : > { %s949_s13 = scalar_lea.vmem %s260_s28, 128  ;;  %s1045_s14 = smov [#allocation4]  }
  0x2c   : > { %p950_p5 = scmp.ne.s32.totalorder %s260_s28, %s949_s13  ;;  %s953_s15 = sshll.u32 %s1045_s14, 4  ;;  %s954_s15 = int_to_ptr.vmem [resolvable:$false] %s953_s15 }
  0x2d   : > { %s955_s16 = scalar_lea.vmem %s954_s15, 256  ;;  %p956_p9 = scmp.lt.s32.totalorder %s260_s28, %s954_s15 }
  0x2e   : > { %p951_p6 = pnand %p950_p5, %p1116_p3  ;;  %p957_p10 = scmp.lt.s32.totalorder %s955_s16, %s949_s13 }
  0x30   : > { %p952_p8 = pneg %p951_p6  ;;  %p958_p7 = por %p957_p10, %p956_p9 }
  0x32   : > { %p959_p12 = pnand %p958_p7, %p952_p8 }
  0x34   : > { %962 = shalt.err (!%p959_p12)
}
  0x35   : > { %875 = dma.hbm_to_vmem [thread:$0]  (%p1116_p3), %s1145_s18, 128, %s260_s28, %s248_s6  }
  0x36 PF: > { %p716_p11 = scmp.ge.s32.totalorder %s1043_s23, 1  ;;  %p264_p13 = scmp.lt.s32.totalorder %s1043_s23, 5 }
  0x38   : > { %p265_p0 = pnand %p716_p11, %p264_p13 }
  0x39   : > { %s271_s17 = sand.u32 (!%p265_p0), 1, %s1027_s19   ;;  %p1282_p7 = scmp.ne.s32.totalorder (!%p265_p0), %s1281_s29, 0 }
  0x3a   : > { %268 = sbr.rel (%p265_p0) target bundleno = 706 (0x2c2), region = 59  ;;  %s717_s26 = sshll.u32 (!%p265_p0), %s271_s17, 5 }
  0x3b   : > { %s718_s7 = sshll.u32 (!%p265_p0), %s271_s17, 3  ;;  %s273_s8 = scalar_lea.vmem (!%p265_p0), [#allocation3], %s717_s26 }
  0x3c   : > { %s278_s9 = scalar_lea.sflag (!%p265_p0), [#allocation5], %s271_s17  ;;  %s281_s10 = scalar_lea.vmem (!%p265_p0), [#allocation4], %s718_s7 }
  0x41   : > { %1014 = dma.done.wait (%p1282_p7), %s278_s9, 128  }
  0x42   : > { %1016 = vsyncadd (%p1282_p7), %s278_s9, 4294967168  ;;  %p719_p3 = scmp.ne.s32.totalorder %s1035_s21, 0 }
  0x43   : > { %v1046_v4 = vmov (!%p719_p3), 0.0  }
  0x44   : > { %321 = sbr.rel (%p719_p3) target bundleno = 75 (0x4b), region = 71  ;;  %322 = vst [vmem:[#allocation2] sm:$0xf] (!%p719_p3), %v1046_v4 }
  0x4b PF: > { %v323_v5 = vld [vmem:[%s273_s8] sm:$0xff]  ;;  %v324_v6 = vld [vmem:[%s273_s8 + $0x8] sm:$0xff]  ;;  %v325_v7 = vld [vmem:[%s273_s8 + $0x10] sm:$0xff]  ;;  %v1047_v14 = vmov 0.0   ;;  %v339_v15 = vlaneseq  ;;  %vm349_vm0 = vcmask 1041409   ;;  %vm351_vm1 = vcmask 64512  }
  0x4c   : > { %v327_v8 = vadd.f32 %v324_v6, %v323_v5  ;;  %v326_v9 = vld [vmem:[%s273_s8 + $0x18] sm:$0xff]  ;;  %v333_v11 = vld [vmem:[%s281_s10] sm:$0xff]  ;;  %418 = vmatprep.mubr.f32.mxu0 %v1047_v14  ;;  %v1048_v24 = vmov 1983009808   ;;  %p721_p1 = scmp.ne.s32.totalorder %s1035_s21, 3 }
  0x4d   : > { %v330_v10 = vadd.f32 %v326_v9, %v325_v7  ;;  %v335_v12 = vunpack.c.h.bf16 %v333_v11  ;;  %v334_v13 = vunpack.c.l.bf16 %v333_v11  ;;  %v340_v16 = vand.u32 127, %v339_v15  ;;  %v336_v31 = vld [vmem:[#allocation2] sm:$0xf]  ;;  %v801_v36 = vld [vmem:[%s1276_s3 + $0x48] sm:$0xff] (!%p721_p1)   ;;  %v802_v38 = vld [vmem:[%s1276_s3 + $0x50] sm:$0xff] (!%p721_p1)  }
  0x4e   : > { %328 = vadd.xlane.f32.xlu0 %v327_v8  ;;  %v342_v17 = vshrl.u32 %v339_v15, 7  ;;  %v429_v25 = vunpack.c.l.s4 %v1048_v24  ;;  %v800_v34 = vld [vmem:[%s1276_s3 + $0x40] sm:$0xff] (!%p721_p1)   ;;  %v793_v37 = vld [vmem:[%s1276_s3 + $0x8] sm:$0xff] (!%p721_p1)   ;;  %v794_v42 = vld [vmem:[%s1276_s3 + $0x10] sm:$0xff] (!%p721_p1)   ;;  %vm598_vm2 = vcmask (!%p721_p1), 25600  }
  0x4f   : > { %354 = vmatprep.subr.mxu0 %v335_v12  ;;  %v730_v35 = vld [vmem:[%s1276_s3] sm:$0xff] (!%p721_p1)   ;;  %v803_v43 = vld [vmem:[%s1276_s3 + $0x58] sm:$0xff] (!%p721_p1)   ;;  %v805_v50 = vld [vmem:[%s1276_s3 + $0x68] sm:$0xff] (!%p721_p1)  }
  0x50   : > { %355 = vmatpush1.msra.mxu0 %v334_v13  ;;  %v343_v19 = vsub.s32 %v340_v16, %v342_v17  ;;  %v430_v26 = vunpack.c.0.s8 %v429_v25  ;;  %v443_v40 = vld [vmem:[%s1274_s1] sm:$0xf] (!%p721_p1)  ;;  %v795_v46 = vld [vmem:[%s1276_s3 + $0x18] sm:$0xff] (!%p721_p1)   ;;  %v797_v51 = vld [vmem:[%s1276_s3 + $0x28] sm:$0xff] (!%p721_p1)  }
  0x51   : > { %844 = vmatprep.subr.bf16.mxu0 (!%p721_p1), %v800_v34  ;;  %v804_v47 = vld [vmem:[%s1276_s3 + $0x60] sm:$0xff] (!%p721_p1)   ;;  %v806_v52 = vld [vmem:[%s1276_s3 + $0x70] sm:$0xff] (!%p721_p1)   ;;  %v807_v54 = vld [vmem:[%s1276_s3 + $0x78] sm:$0xff] (!%p721_p1)  }
  0x52   : > { %331 = vadd.xlane.f32.xlu0 %v330_v10  ;;  %v433_v28 = vsub.s32 %v430_v26, %v342_v17  ;;  %v796_v49 = vld [vmem:[%s1276_s3 + $0x20] sm:$0xff] (!%p721_p1)   ;;  %v798_v53 = vld [vmem:[%s1276_s3 + $0x30] sm:$0xff] (!%p721_p1)   ;;  %v799_v55 = vld [vmem:[%s1276_s3 + $0x38] sm:$0xff] (!%p721_p1)  }
  0x53   : > { %v722_v57 = vld [vmem:[%s1277_s4] ss:$0 sm:$0xff] (!%p721_p1) }
  0xdb   : > { %v329_v18 = vpop.xlane.xlu0 %328 }
  0xdc   : > { %v344_v21 = vrot.slane %v329_v18, %v343_v19 }
  0xdf   : > { %v332_v20 = vpop.xlane.xlu0 %331 }
  0xe0   : > { %v348_v22 = vrot.slane %v332_v20, %v343_v19 }
  0xe2   : > { %v350_v23 = vsel %vm349_vm0, %v348_v22, %v344_v21 }
  0xe3   : > { %720 = vmatmul.mubr.msk.f32.vlgmr.msra.gmra.mrb[0].mxu0 %vm351_vm1, %v350_v23 }
  0xe4   : > { %846 = vmatpush3.bf16.msra.mxu0 (!%p721_p1), %v730_v35 }
  0xe5   : > { %848 = vmatprep.subr.bf16.mxu0 (!%p721_p1), %v801_v36 }
  0xe8   : > { %850 = vmatpush3.bf16.msra.mxu0 (!%p721_p1), %v793_v37 }
  0xe9   : > { %852 = vmatprep.subr.bf16.mxu0 (!%p721_p1), %v802_v38 }
  0xec   : > { %854 = vmatpush3.bf16.msra.mxu0 (!%p721_p1), %v794_v42 }
  0xed   : > { %856 = vmatprep.subr.bf16.mxu0 (!%p721_p1), %v803_v43 }
  0xf0   : > { %858 = vmatpush3.bf16.msra.mxu0 (!%p721_p1), %v795_v46 }
  0xf1   : > { %860 = vmatprep.subr.bf16.mxu0 (!%p721_p1), %v804_v47 }
  0xf4   : > { %862 = vmatpush3.bf16.msra.mxu0 (!%p721_p1), %v796_v49 }
  0xf5   : > { %864 = vmatprep.subr.bf16.mxu0 (!%p721_p1), %v805_v50 }
  0xf8   : > { %866 = vmatpush3.bf16.msra.mxu0 (!%p721_p1), %v797_v51 }
  0xf9   : > { %868 = vmatprep.subr.bf16.mxu0 (!%p721_p1), %v806_v52 }
  0xfc   : > { %870 = vmatpush3.bf16.msra.mxu0 (!%p721_p1), %v798_v53 }
  0xfd   : > { %872 = vmatprep.subr.bf16.mxu0 (!%p721_p1), %v807_v54 }
 0x100   : > { %874 = vmatpush3.bf16.msra.mxu0 (!%p721_p1), %v799_v55 }
 0x1b6   : > { %v420_v27 = vpop.f32.mrb[0].mxu0 }
 0x1b7   : > { %v422_v29 = vpop.f32.mrb[1].mxu0 }
 0x1b8   : > { %v427_v30 = vcombine.low %v420_v27, %v422_v29  ;;  %441 = sbr.rel (%p721_p1) target bundleno = 681 (0x2a9), region = 75 }
 0x1ba   : > { %v434_v32 = vrot.slane %v427_v30, %v433_v28 }
 0x1bc   : > { %v436_v33 = vadd.f32 %v434_v32, %v336_v31 }
 0x1be   : > { %437 = vst [vmem:[#allocation2] sm:$0xf] %v436_v33 }
 0x1c5   : > { %v442_v39 = vld [vmem:[#allocation2] sm:$0xf] }
 0x1c6   : > { %v444_v41 = vadd.f32 %v443_v40, %v442_v39 }
 0x1c8   : > { %v445_v44 = vmax.f32 %v444_v41, 0.0 }
 0x1ca   : > { %v524_v45 = vrot.slane %v445_v44, %v433_v28 }
 0x1cc   : > { %v525_v48 = vcombine.high %v524_v45, %v524_v45 }
 0x1ce   : > { %592 = vmatprep.mubr.f32.mxu0 %v525_v48 }
 0x1cf   : > { %593 = vmatmul.mubr.f32.vlgmr.msra.gmra.mrb[0].mxu0 %v524_v45 }
 0x2a2   : > { %v840_v56 = vpop.f32.mrb[0].mxu0 }
 0x2a3   : > { %v841_v58 = vpop.f32.mrb[1].mxu0 }
 0x2a4   : > { %v842_v59 = vadd.f32 %v841_v58, %v840_v56 }
 0x2a6   : > { %v595_v60 = vadd.f32 %v842_v59, %v722_v57 }
 0x2a8   : > { %599 = vst.msk [vmem:[#allocation7] sm:$0x3] %vm598_vm2, %v595_v60 }
 0x2a9 PF: > { %p1229_p2 = scmp.eq.s32.totalorder %s706_s24, 3  ;;  %s1049_s29 = smov [#allocation7]  }
 0x2aa   : > { %s609_s18 = sshll.u32 %s1049_s29, 4  ;;  %s610_s18 = int_to_ptr.vmem [resolvable:$true] %s609_s18 }
 0x2ab   : > { %s963_s28 = scalar_lea.vmem %s610_s18, 32  ;;  %p970_p8 = scmp.lt.s32.totalorder %s610_s18, %s610_s18 }
 0x2ac   : > { %p964_p4 = scmp.ne.s32.totalorder %s610_s18, %s963_s28  ;;  %p971_p9 = scmp.lt.s32.totalorder %s963_s28, %s963_s28 }
 0x2ae   : > { %p965_p5 = pnand %p964_p4, %p1229_p2  ;;  %p972_p10 = por %p971_p9, %p970_p8 }
 0x2b0   : > { %p966_p6 = pneg %p965_p5 }
 0x2b2   : > { %p973_p12 = pnand %p972_p10, %p966_p6 }
 0x2b4   : > { %976 = shalt.err (!%p973_p12)
}
 0x2b5   : > { %s977_s24 = scalar_lea.hbm %s1278_s5, 32 }
 0x2b6   : > { %p978_p11 = scmp.ne.s32.totalorder %s1278_s5, %s977_s24  ;;  %p983_p7 = scmp.lt.u32.totalorder %s977_s24, %s1278_s5 }
 0x2b8   : > { %p979_p13 = pnand %p978_p11, %p1229_p2 }
 0x2ba   : > { %p980_p0 = pneg %p979_p13 }
 0x2bc   : > { %p985_p3 = pnand %p983_p7, %p980_p0 }
 0x2be   : > { %988 = shalt.err (!%p985_p3)
}
 0x2bf   : > { %878 = dma.vmem_to_hbm [thread:$0]  (%p1229_p2), %s610_s18, 32, %s1278_s5, [#allocation6]  }
 0x2c0   : > { %1018 = dma.done.wait (%p1229_p2), [#allocation6], 32  }
 0x2c1   : > { %1020 = vsyncadd (%p1229_p2), [#allocation6], 4294967264 }
 0x2c2 PF: > { %s19_s23 = sadd.s32 1, %s1043_s23   ;;  %s1284_s18 = smov %s1027_s19 }
 0x2c3   : > { %p16_p1 = scmp.ge.s32.totalorder %s19_s23, 6   ;;  %s1285_s19 = smov %s1031_s20 }
 0x2c4   : > { %s1286_s20 = smov %s1130_s30  ;;  %s1287_s21 = smov %s1039_s22 }
 0x2c5   : > { %s1288_s22 = smov %s1290_s25  ;;  %18 = sbr.rel (!%p16_p1) target bundleno = 5 (0x5), region = 120 }
 0x2cc   :  { %622 = vsyncpa [#allocation5], 1 }
 0x2cd   :  { %624 = vsyncpa [#allocation5 + $0x1], 1 }
 0x2ce   :  { %625 = vsyncpa [#allocation6], 1 }
 0x2cf   :  { %627 = vsyncpa [#allocation6 + $0x1], 1 }

</bundles_post_ra>
